<compile_context>
chip_gen: v5e
topology: v5e:2x2
jax: 0.10.0
libtpu: 0.0.40
codegen_flags: <defaults>
</compile_context>

<pallas_src>
import jax
import jax.numpy as jnp
from jax import lax
from jax.experimental import pallas as pl
from jax.experimental.pallas import tpu as pltpu

# ----- problem sizes (small, consistent with the module) -----
B = 8                      # batch
SUB_DIMS = (24, 40, 56)    # synthetic per-submodel output widths
SUM_SUB = sum(SUB_DIMS)    # 120 = K of the fused matmul
K_PAD = 128                # K zero-padded to one 128-lane tile
LIN_IN = (32, 32, 64)      # linear_features[name]['in'] per model
SUM_IN = sum(LIN_IN)       # 128 = in_features of predictor[0]
HID = 300                  # output_features
HID_PAD = 384              # 3 full 128-lane vregs (zero-padded, exact)
EPS = 1e-5


def aggregated_kernel(h1_ref, h2_ref, h3_ref, wf_ref, p_ref, o_ref, x_scr):
    # ---- in-kernel concat: assemble lane-dense [B, 128] activations in VMEM ----
    x_scr[...] = jnp.zeros_like(x_scr)          # zero-fills the 120:128 tail too
    x_scr[:, 0:24] = h1_ref[...]
    x_scr[:, 24:64] = h2_ref[...]
    x_scr[:, 64:120] = h3_ref[...]

    # Fused (per-model Linears + concat + predictor Linear0): ONE bf16 MXU matmul
    # with f32 accumulation.  Padded x columns and padded W rows are zero.
    x_bf = x_scr[...].astype(jnp.bfloat16)
    z = jnp.dot(x_bf, wf_ref[...], preferred_element_type=jnp.float32)
    z = jnp.maximum(z + p_ref[0:1, :], 0.0)                    # + fused bias, ReLU

    # BatchNorm1d, training mode (biased batch stats), folded to scale/shift.
    # All f32 (v5e has no bf16 VPU/EUP).  Padded columns: z=0, gamma=0 -> scale=0,
    # beta=0 -> shift=0, w2=0, so they contribute exactly 0 downstream.
    mean = jnp.mean(z, axis=0, keepdims=True)                  # [1, HID_PAD]
    var = jnp.mean((z - mean) * (z - mean), axis=0, keepdims=True)
    scale = p_ref[1:2, :] * lax.rsqrt(var + EPS)               # gamma * rsqrt(var+eps)
    shift = p_ref[2:3, :] - mean * scale                       # beta - mean*scale
    z_bn = z * scale + shift

    # Final Linear(HID -> 1): VPU multiply + cross-lane reduce (cheaper than a
    # 1-column MXU matmul); w2 row and b2 live in the packed param slab.
    o_ref[...] = (jnp.sum(z_bn * p_ref[3:4, :], axis=-1, keepdims=True)
                  + p_ref[4:5, 0:1])


@jax.jit
def aggregated_forward(h1, h2, h3, w_fused, param_slab):
    b = h1.shape[0]
    vmem = pl.BlockSpec(memory_space=pltpu.MemorySpace.VMEM)
    cost = pl.CostEstimate(
        flops=2 * b * K_PAD * HID_PAD,
        transcendentals=HID_PAD,                       # one rsqrt per column
        bytes_accessed=(K_PAD * HID_PAD * 2            # bf16 fused weight slab
                        + 8 * HID_PAD * 4              # f32 param slab
                        + b * SUM_SUB * 4              # activations in
                        + b * 4),                      # output
    )
    return pl.pallas_call(
        aggregated_kernel,
        out_shape=jax.ShapeDtypeStruct((b, 1), jnp.float32),
        in_specs=[vmem, vmem, vmem, vmem, vmem],
        out_specs=vmem,
        scratch_shapes=[pltpu.VMEM((b, K_PAD), jnp.float32)],
        cost_estimate=cost,
    )(h1, h2, h3, w_fused, param_slab)


def make_fused_params(params):
    """One-time (init-time) algebraic fusion + packing of all parameters."""
    (wl1, bl1, wl2, bl2, wl3, bl3, w1, b1, gamma, beta, w2, b2) = params

    # Block-diagonal of the per-model linear weights: [SUM_SUB, SUM_IN].
    blkdiag = jnp.zeros((SUM_SUB, SUM_IN), jnp.float32)
    blkdiag = blkdiag.at[0:24, 0:32].set(wl1)
    blkdiag = blkdiag.at[24:64, 32:64].set(wl2)
    blkdiag = blkdiag.at[64:120, 64:128].set(wl3)

    w_fused = blkdiag @ w1                                          # [120, 300]
    b_fused = jnp.concatenate([bl1, bl2, bl3], axis=1) @ w1 + b1    # [1, 300]

    # Zero-pad K 120->128 and HID 300->384, store in bf16 (MXU-native, half the
    # DMA).  Fused in f32 first, cast once at the end.
    w_pad = (jnp.zeros((K_PAD, HID_PAD), jnp.float32)
             .at[:SUM_SUB, :HID].set(w_fused)).astype(jnp.bfloat16)

    # Packed f32 [8, HID_PAD] slab: row0=b_fused, row1=gamma, row2=beta,
    # row3=w2 (as a row), [4,0]=b2, rest zero.
    slab = jnp.zeros((8, HID_PAD), jnp.float32)
    slab = slab.at[0, :HID].set(b_fused[0])
    slab = slab.at[1, :HID].set(gamma[0])
    slab = slab.at[2, :HID].set(beta[0])
    slab = slab.at[3, :HID].set(w2[:, 0])
    slab = slab.at[4, 0].set(b2[0, 0])
    return w_pad, slab


def _linear_params(key, fan_in, fan_out):
    # PyTorch-style uniform(+/- 1/sqrt(fan_in)) init, deterministic.
    kw, kb = jax.random.split(key)
    bound = 1.0 / jnp.sqrt(jnp.float32(fan_in))
    w = jax.random.uniform(kw, (fan_in, fan_out), jnp.float32, -bound, bound)
    b = jax.random.uniform(kb, (1, fan_out), jnp.float32, -bound, bound)
    return w, b


def _reference(h1, h2, h3, params):
    # Pure-JAX f32 reference of the ORIGINAL (unfused) module math.
    (wl1, bl1, wl2, bl2, wl3, bl3, w1, b1, gamma, beta, w2, b2) = params
    f = jnp.concatenate([h1 @ wl1 + bl1, h2 @ wl2 + bl2, h3 @ wl3 + bl3], axis=1)
    z = jnp.maximum(f @ w1 + b1, 0.0)
    mean = jnp.mean(z, axis=0, keepdims=True)
    var = jnp.mean((z - mean) ** 2, axis=0, keepdims=True)
    z = (z - mean) / jnp.sqrt(var + EPS) * gamma + beta
    return z @ w2 + b2


if __name__ == "__main__":
    key = jax.random.PRNGKey(0)
    keys = jax.random.split(key, 9)

    # Synthetic sub-model outputs.
    # TODO(synk): the per-dataset sub-models in `self.models` are user-supplied
    # nn.Modules with unknown architecture; their outputs are synthesized here.
    h1 = jax.random.normal(keys[0], (B, SUB_DIMS[0]), jnp.float32)
    h2 = jax.random.normal(keys[1], (B, SUB_DIMS[1]), jnp.float32)
    h3 = jax.random.normal(keys[2], (B, SUB_DIMS[2]), jnp.float32)

    wl1, bl1 = _linear_params(keys[3], SUB_DIMS[0], LIN_IN[0])
    wl2, bl2 = _linear_params(keys[4], SUB_DIMS[1], LIN_IN[1])
    wl3, bl3 = _linear_params(keys[5], SUB_DIMS[2], LIN_IN[2])
    w1, b1 = _linear_params(keys[6], SUM_IN, HID)
    gamma = jnp.ones((1, HID), jnp.float32)    # BatchNorm1d weight init
    beta = jnp.zeros((1, HID), jnp.float32)    # BatchNorm1d bias init
    w2, b2 = _linear_params(keys[7], HID, 1)

    params = (wl1, bl1, wl2, bl2, wl3, bl3, w1, b1, gamma, beta, w2, b2)

    # Init-time fusion/packing (NOT per forward call).
    w_fused, param_slab = make_fused_params(params)
    w_fused = jax.block_until_ready(w_fused)
    param_slab = jax.block_until_ready(param_slab)

    out = aggregated_forward(h1, h2, h3, w_fused, param_slab)
    out = jax.block_until_ready(out)

    ref = _reference(h1, h2, h3, params)
    assert out.shape == (B, 1)
    # bf16 weights/activations at the MXU -> slightly looser tolerance than pure f32.
    assert jnp.allclose(out, ref, atol=2e-2, rtol=2e-2), "mismatch vs JAX reference"

    print("KERNEL_OK")
</pallas_src>

<mosaic_0001>
module attributes {stable_mosaic.version = 11 : i64} {
  func.func @aggregated_kernel(%arg0: memref<8x24xf32, #tpu.memory_space<vmem>>, %arg1: memref<8x40xf32, #tpu.memory_space<vmem>>, %arg2: memref<8x56xf32, #tpu.memory_space<vmem>>, %arg3: memref<128x384xbf16, #tpu.memory_space<vmem>>, %arg4: memref<8x384xf32, #tpu.memory_space<vmem>>, %arg5: memref<8x1xf32, #tpu.memory_space<vmem>>, %arg6: memref<8x128xf32, #tpu.memory_space<vmem>>) attributes {dimension_semantics = [], scalar_prefetch = 0 : i64, scratch_operands = 1 : i64, tpu.core_type = #tpu.core_type<tc>} {
    %cst = arith.constant 0.000000e+00 : f32
    %0 = vector.broadcast %cst : f32 to vector<8x128xf32>
    %c0 = arith.constant 0 : index
    %c0_0 = arith.constant 0 : index
    %1 = vector.load %arg6[%c0, %c0_0] : memref<8x128xf32, #tpu.memory_space<vmem>>, vector<8x128xf32>
    tpu.vector_store %arg6[%c0, %c0_0], %0 {strides = array<i32>} : memref<8x128xf32, #tpu.memory_space<vmem>>, vector<8x128xf32>,
    %c0_1 = arith.constant 0 : index
    %c0_2 = arith.constant 0 : index
    %2 = vector.load %arg0[%c0_1, %c0_2] : memref<8x24xf32, #tpu.memory_space<vmem>>, vector<8x24xf32>
    %c0_3 = arith.constant 0 : index
    %c0_4 = arith.constant 0 : index
    %3 = vector.load %arg6[%c0_3, %c0_4] : memref<8x128xf32, #tpu.memory_space<vmem>>, vector<8x24xf32>
    tpu.vector_store %arg6[%c0_3, %c0_4], %2 {strides = array<i32>} : memref<8x128xf32, #tpu.memory_space<vmem>>, vector<8x24xf32>,
    %c0_5 = arith.constant 0 : index
    %c0_6 = arith.constant 0 : index
    %4 = vector.load %arg1[%c0_5, %c0_6] : memref<8x40xf32, #tpu.memory_space<vmem>>, vector<8x40xf32>
    %c0_7 = arith.constant 0 : index
    %c24 = arith.constant 24 : index
    %5 = vector.load %arg6[%c0_7, %c24] : memref<8x128xf32, #tpu.memory_space<vmem>>, vector<8x40xf32>
    tpu.vector_store %arg6[%c0_7, %c24], %4 {strides = array<i32>} : memref<8x128xf32, #tpu.memory_space<vmem>>, vector<8x40xf32>,
    %c0_8 = arith.constant 0 : index
    %c0_9 = arith.constant 0 : index
    %6 = vector.load %arg2[%c0_8, %c0_9] : memref<8x56xf32, #tpu.memory_space<vmem>>, vector<8x56xf32>
    %c0_10 = arith.constant 0 : index
    %c64 = arith.constant 64 : index
    %7 = vector.load %arg6[%c0_10, %c64] : memref<8x128xf32, #tpu.memory_space<vmem>>, vector<8x56xf32>
    tpu.vector_store %arg6[%c0_10, %c64], %6 {strides = array<i32>} : memref<8x128xf32, #tpu.memory_space<vmem>>, vector<8x56xf32>,
    %c0_11 = arith.constant 0 : index
    %c0_12 = arith.constant 0 : index
    %8 = vector.load %arg6[%c0_11, %c0_12] : memref<8x128xf32, #tpu.memory_space<vmem>>, vector<8x128xf32>
    %9 = arith.truncf %8 : vector<8x128xf32> to vector<8x128xbf16>
    %c0_13 = arith.constant 0 : index
    %c0_14 = arith.constant 0 : index
    %10 = vector.load %arg3[%c0_13, %c0_14] : memref<128x384xbf16, #tpu.memory_space<vmem>>, vector<128x384xbf16>
    %cst_15 = arith.constant dense<0.000000e+00> : vector<8x384xf32>
    %11 = tpu.matmul %9, %10, %cst_15 {dimension_numbers = #tpu.dot_dimension_numbers<[1], [0], [0], [1], [0, 0, 1, 1], [], []>} : vector<8x128xbf16>, vector<128x384xbf16>, vector<8x384xf32> -> vector<8x384xf32>
    %c0_16 = arith.constant 0 : index
    %c0_17 = arith.constant 0 : index
    %12 = vector.load %arg4[%c0_16, %c0_17] : memref<8x384xf32, #tpu.memory_space<vmem>>, vector<1x384xf32>
    %13 = vector.broadcast %12 : vector<1x384xf32> to vector<8x384xf32>
    %14 = arith.addf %11, %13 : vector<8x384xf32>
    %cst_18 = arith.constant 0.000000e+00 : f32
    %15 = vector.broadcast %cst_18 : f32 to vector<8x384xf32>
    %16 = arith.maximumf %14, %15 : vector<8x384xf32>
    %cst_19 = arith.constant dense<0.000000e+00> : vector<384xf32>
    %17 = vector.multi_reduction <add>, %16, %cst_19 [0] : vector<8x384xf32> to vector<384xf32>
    %18 = vector.shape_cast %17 : vector<384xf32> to vector<1x384xf32>
    %cst_20 = arith.constant 8.000000e+00 : f32
    %19 = vector.broadcast %cst_20 : f32 to vector<1x384xf32>
    %20 = arith.divf %18, %19 : vector<1x384xf32>
    %21 = vector.broadcast %20 : vector<1x384xf32> to vector<8x384xf32>
    %22 = arith.subf %16, %21 : vector<8x384xf32>
    %23 = vector.broadcast %20 : vector<1x384xf32> to vector<8x384xf32>
    %24 = arith.subf %16, %23 : vector<8x384xf32>
    %25 = arith.mulf %22, %24 : vector<8x384xf32>
    %cst_21 = arith.constant dense<0.000000e+00> : vector<384xf32>
    %26 = vector.multi_reduction <add>, %25, %cst_21 [0] : vector<8x384xf32> to vector<384xf32>
    %27 = vector.shape_cast %26 : vector<384xf32> to vector<1x384xf32>
    %cst_22 = arith.constant 8.000000e+00 : f32
    %28 = vector.broadcast %cst_22 : f32 to vector<1x384xf32>
    %29 = arith.divf %27, %28 : vector<1x384xf32>
    %c1 = arith.constant 1 : index
    %c0_23 = arith.constant 0 : index
    %30 = vector.load %arg4[%c1, %c0_23] : memref<8x384xf32, #tpu.memory_space<vmem>>, vector<1x384xf32>
    %cst_24 = arith.constant 9.99999974E-6 : f32
    %31 = vector.broadcast %cst_24 : f32 to vector<1x384xf32>
    %32 = arith.addf %29, %31 : vector<1x384xf32>
    %33 = math.rsqrt %32 : vector<1x384xf32>
    %34 = arith.mulf %30, %33 : vector<1x384xf32>
    %c2 = arith.constant 2 : index
    %c0_25 = arith.constant 0 : index
    %35 = vector.load %arg4[%c2, %c0_25] : memref<8x384xf32, #tpu.memory_space<vmem>>, vector<1x384xf32>
    %36 = arith.mulf %20, %34 : vector<1x384xf32>
    %37 = arith.subf %35, %36 : vector<1x384xf32>
    %38 = vector.broadcast %34 : vector<1x384xf32> to vector<8x384xf32>
    %39 = arith.mulf %16, %38 : vector<8x384xf32>
    %40 = vector.broadcast %37 : vector<1x384xf32> to vector<8x384xf32>
    %41 = arith.addf %39, %40 : vector<8x384xf32>
    %c3 = arith.constant 3 : index
    %c0_26 = arith.constant 0 : index
    %42 = vector.load %arg4[%c3, %c0_26] : memref<8x384xf32, #tpu.memory_space<vmem>>, vector<1x384xf32>
    %43 = vector.broadcast %42 : vector<1x384xf32> to vector<8x384xf32>
    %44 = arith.mulf %41, %43 : vector<8x384xf32>
    %cst_27 = arith.constant dense<0.000000e+00> : vector<8xf32>
    %45 = vector.multi_reduction <add>, %44, %cst_27 [1] : vector<8x384xf32> to vector<8xf32>
    %46 = vector.shape_cast %45 : vector<8xf32> to vector<8x1xf32>
    %c4 = arith.constant 4 : index
    %c0_28 = arith.constant 0 : index
    %47 = vector.load %arg4[%c4, %c0_28] : memref<8x384xf32, #tpu.memory_space<vmem>>, vector<1x1xf32>
    %48 = vector.broadcast %47 : vector<1x1xf32> to vector<8x1xf32>
    %49 = arith.addf %46, %48 : vector<8x1xf32>
    %c0_29 = arith.constant 0 : index
    %c0_30 = arith.constant 0 : index
    %50 = vector.load %arg5[%c0_29, %c0_30] : memref<8x1xf32, #tpu.memory_space<vmem>>, vector<8x1xf32>
    tpu.vector_store %arg5[%c0_29, %c0_30], %49 {strides = array<i32>} : memref<8x1xf32, #tpu.memory_space<vmem>>, vector<8x1xf32>,
    return
  }
}

</mosaic_0001>

<bundles_post_ra>
// kernel: aggregated_forward.1
= control target key start
LH: loop header
LB: loop body
LE: loop exit
PB: predicated region body
PF: predicated region fallthrough
CT: control target
= control target key end

     0   :  { %10 = vsyncpa [#allocation4], 0  ;;  %s840_s0 = inlined_call_operand.hbm [shape: f32[8,24], index: 0, kind: input, shape index: {}]   ;;  %s841_s1 = inlined_call_operand.hbm [shape: f32[8,40], index: 1, kind: input, shape index: {}]   ;;  %s842_s2 = inlined_call_operand.hbm [shape: f32[8,56], index: 2, kind: input, shape index: {}]   ;;  %s843_s3 = inlined_call_operand.hbm [shape: bf16[128,384], index: 3, kind: input, shape index: {}]   ;;  %s844_s4 = inlined_call_operand.hbm [shape: f32[8,384], index: 4, kind: input, shape index: {}]   ;;  %s845_s5 = inlined_call_operand.vmem [shape: f32[8,1], index: 5, kind: output, shape index: {}]  }
   0x1   :  { %11 = vsyncpa [#allocation6], 0  ;;  %s29_s20 = sshll.u32 %s841_s1, 4  ;;  %s30_s20 = int_to_ptr.hbm [resolvable:$true] %s29_s20 }
   0x2   :  { %12 = vsyncpa [#allocation9], 0  ;;  %s747_s21 = smov [#allocation5]   ;;  %s50_s25 = sshll.u32 %s843_s3, 4  ;;  %s51_s25 = int_to_ptr.hbm [resolvable:$true] %s50_s25 }
   0x3   :  { %s31_s22 = sshll.u32 %s747_s21, 4  ;;  %s748_s26 = smov [#allocation8]   ;;  %s32_s22 = int_to_ptr.vmem [resolvable:$true] %s31_s22 }
   0x4   :  { %34 = dma.hbm_to_vmem [thread:$0]  %s30_s20, 128, %s32_s22, [#allocation6]  }
   0x5   :  { %s52_s27 = sshll.u32 %s748_s26, 4  ;;  %s749_s28 = smov 192   ;;  %s53_s27 = int_to_ptr.vmem [resolvable:$true] %s52_s27 }
   0x6   :  { %s750_s29 = smov 12   ;;  %s18_s1 = sshll.u32 %s840_s0, 4  ;;  %s19_s1 = int_to_ptr.hbm [resolvable:$true] %s18_s1 }
   0x7   :  { %58 = dma.hbm_to_vmem [thread:$0]  %s51_s25, 3072, %s53_s27, [#allocation9], %s749_s28, %s749_s28, %s750_s29  }
   0x8   :  { %s751_s7 = smov [#allocation3]   ;;  %s40_s3 = sshll.u32 %s842_s2, 4  ;;  %s41_s3 = int_to_ptr.hbm [resolvable:$true] %s40_s3 }
   0x9   :  { %s20_s8 = sshll.u32 %s751_s7, 4  ;;  %s752_s11 = smov [#allocation7]   ;;  %s21_s8 = int_to_ptr.vmem [resolvable:$true] %s20_s8 }
   0xa   :  { %23 = dma.hbm_to_vmem [thread:$0]  %s19_s1, 128, %s21_s8, [#allocation4]  }
   0xb   :  { %s42_s12 = sshll.u32 %s752_s11, 4  ;;  %s64_s15 = sshll.u32 %s844_s4, 4  ;;  %s43_s12 = int_to_ptr.vmem [resolvable:$true] %s42_s12  ;;  %s65_s15 = int_to_ptr.hbm [resolvable:$true] %s64_s15 }
   0xc   :  { %45 = dma.hbm_to_vmem [thread:$0]  %s41_s3, 128, %s43_s12, [#allocation6]  }
   0xd   :  { %s753_s0 = smov [#allocation10]  }
   0xe   :  { %s66_s16 = sshll.u32 %s753_s0, 4  ;;  %s67_s16 = int_to_ptr.vmem [resolvable:$true] %s66_s16 }
   0xf   :  { %69 = dma.hbm_to_vmem [thread:$0]  %s65_s15, 384, %s67_s16, [#allocation9]  }
  0x10   :  { %741 = dma.done.wait [#allocation4], 128  }
  0x11   :  { %742 = vsyncadd [#allocation4], 4294967168 }
  0x12   :  { %743 = dma.done.wait [#allocation6], 256  }
  0x13   :  { %744 = vsyncadd [#allocation6], 4294967040 }
  0x14   :  { %745 = dma.done.wait [#allocation9], 3456  }
  0x15   :  { %746 = vsyncadd [#allocation9], 4294963840  ;;  %v754_v0 = vmov 0.0   ;;  %v94_v1 = vld [vmem:[#allocation5] sm:$0xff]  ;;  %v568_v2 = vld [vmem:[#allocation8 + $0xa8] sm:$0xf] }
  0x16   :  { %90 = vst [vmem:[#allocation2] sm:$0xff] %v754_v0  ;;  %s755_s2 = smov 24   ;;  %v600_v3 = vld [vmem:[#allocation8 + $0xb0] sm:$0xf0]  ;;  %v599_v4 = vld [vmem:[#allocation8 + $0xac] sm:$0xf] }
  0x17   :  { %96 = vrot.lane.b32.xlu0 %v94_v1, %s755_s2  ;;  %v570_v5 = vld [vmem:[#allocation8 + $0xb4] sm:$0xf0]  ;;  %v569_v6 = vor.u32 %v600_v3, %v568_v2  ;;  %v576_v8 = vld [vmem:[#allocation8 + $0xb0] sm:$0xf]  ;;  %v601_v9 = vld [vmem:[#allocation8 + $0xb8] sm:$0xf0] }
  0x18   :  { %v573_v7 = vor.u32 %v599_v4, %v570_v5  ;;  %v556_v10 = vld [vmem:[#allocation8 + $0x90] sm:$0xf]  ;;  %v577_v11 = vor.u32 %v601_v9, %v576_v8  ;;  %v597_v12 = vld [vmem:[#allocation8 + $0x98] sm:$0xf0]  ;;  %v596_v13 = vld [vmem:[#allocation8 + $0x94] sm:$0xf] }
  0x19   :  { %v558_v14 = vld [vmem:[#allocation8 + $0x9c] sm:$0xf0]  ;;  %278 = vmatpush.bf16.msra.mxu0 %v569_v6  ;;  %v557_v15 = vor.u32 %v597_v12, %v556_v10  ;;  %v564_v17 = vld [vmem:[#allocation8 + $0x98] sm:$0xf]  ;;  %v598_v18 = vld [vmem:[#allocation8 + $0xa0] sm:$0xf0] }
  0x1a   :  { %291 = vmatpush.bf16.msra.mxu1 %v573_v7  ;;  %v561_v16 = vor.u32 %v596_v13, %v558_v14  ;;  %v544_v19 = vld [vmem:[#allocation8 + $0x78] sm:$0xf]  ;;  %304 = vmatpush.bf16.msra.mxu2 %v577_v11  ;;  %v565_v20 = vor.u32 %v598_v18, %v564_v17  ;;  %v594_v21 = vld [vmem:[#allocation8 + $0x80] sm:$0xf0]  ;;  %v593_v22 = vld [vmem:[#allocation8 + $0x7c] sm:$0xf] }
  0x1b   :  { %v546_v23 = vld [vmem:[#allocation8 + $0x84] sm:$0xf0]  ;;  %v101_v24 = vld [vmem:[#allocation7] sm:$0xff]  ;;  %v552_v25 = vld [vmem:[#allocation8 + $0x80] sm:$0xf]  ;;  %v545_v27 = vor.u32 %v594_v21, %v544_v19  ;;  %s756_s4 = smov 64  }
  0x1c   :  { %v595_v26 = vld [vmem:[#allocation8 + $0x88] sm:$0xf0]  ;;  %v549_v28 = vor.u32 %v593_v22, %v546_v23  ;;  %v532_v29 = vld [vmem:[#allocation8 + $0x60] sm:$0xf]  ;;  %v590_v32 = vld [vmem:[#allocation8 + $0x64] sm:$0xf] }
  0x1d   :  { %279 = vmatpush.bf16.msra.mxu0 %v557_v15  ;;  %v553_v30 = vor.u32 %v595_v26, %v552_v25  ;;  %v591_v31 = vld [vmem:[#allocation8 + $0x68] sm:$0xf0]  ;;  %v534_v33 = vld [vmem:[#allocation8 + $0x6c] sm:$0xf0]  ;;  %v540_v34 = vld [vmem:[#allocation8 + $0x68] sm:$0xf] }
  0x1e   :  { %292 = vmatpush.bf16.msra.mxu1 %v561_v16  ;;  %305 = vmatpush.bf16.msra.mxu2 %v565_v20  ;;  %v592_v35 = vld [vmem:[#allocation8 + $0x70] sm:$0xf0]  ;;  %v533_v36 = vor.u32 %v591_v31, %v532_v29  ;;  %v537_v37 = vor.u32 %v590_v32, %v534_v33  ;;  %vm92_vm0 = vcmask 195584   ;;  %v91_v39 = vld [vmem:[#allocation3] sm:$0xff]  ;;  %v522_v44 = vld [vmem:[#allocation8 + $0x54] sm:$0xf0] }
  0x1f   :  { %103 = vrot.lane.b32.xlu0 %v101_v24, %s756_s4  ;;  %v541_v38 = vor.u32 %v592_v35, %v540_v34  ;;  %93 = vst.msk [vmem:[#allocation2] sm:$0xff] %vm92_vm0, %v91_v39  ;;  %v520_v40 = vld [vmem:[#allocation8 + $0x48] sm:$0xf]  ;;  %v588_v41 = vld [vmem:[#allocation8 + $0x50] sm:$0xf0]  ;;  %vm99_vm1 = vcmask 523456  }
  0x20   :  { %v587_v42 = vld [vmem:[#allocation8 + $0x4c] sm:$0xf]  ;;  %v521_v43 = vor.u32 %v588_v41, %v520_v40  ;;  %v528_v45 = vld [vmem:[#allocation8 + $0x50] sm:$0xf]  ;;  %v589_v46 = vld [vmem:[#allocation8 + $0x58] sm:$0xf0] }
  0x21   :  { %280 = vmatpush.bf16.msra.mxu0 %v545_v27  ;;  %v525_v47 = vor.u32 %v587_v42, %v522_v44  ;;  %v529_v48 = vor.u32 %v589_v46, %v528_v45  ;;  %v508_v49 = vld [vmem:[#allocation8 + $0x30] sm:$0xf]  ;;  %v585_v50 = vld [vmem:[#allocation8 + $0x38] sm:$0xf0]  ;;  %v584_v51 = vld [vmem:[#allocation8 + $0x34] sm:$0xf] }
  0x22   :  { %293 = vmatpush.bf16.msra.mxu1 %v549_v28  ;;  %306 = vmatpush.bf16.msra.mxu2 %v553_v30  ;;  %v509_v52 = vor.u32 %v585_v50, %v508_v49  ;;  %v510_v53 = vld [vmem:[#allocation8 + $0x3c] sm:$0xf0]  ;;  %v516_v54 = vld [vmem:[#allocation8 + $0x38] sm:$0xf]  ;;  %v586_v55 = vld [vmem:[#allocation8 + $0x40] sm:$0xf0] }
  0x23   :  { %v513_v56 = vor.u32 %v584_v51, %v510_v53  ;;  %v517_v57 = vor.u32 %v586_v55, %v516_v54  ;;  %v496_v58 = vld [vmem:[#allocation8 + $0x18] sm:$0xf]  ;;  %v582_v59 = vld [vmem:[#allocation8 + $0x20] sm:$0xf0]  ;;  %v581_v60 = vld [vmem:[#allocation8 + $0x1c] sm:$0xf] }
  0x24   :  { %v497_v61 = vor.u32 %v582_v59, %v496_v58  ;;  %v498_v62 = vld [vmem:[#allocation8 + $0x24] sm:$0xf0]  ;;  %v504_v63 = vld [vmem:[#allocation8 + $0x20] sm:$0xf]  ;;  %v583_v0 = vld [vmem:[#allocation8 + $0x28] sm:$0xf0] }
  0x25   :  { %281 = vmatpush.bf16.msra.mxu0 %v533_v36  ;;  %v501_v1 = vor.u32 %v581_v60, %v498_v62  ;;  %v505_v2 = vor.u32 %v583_v0, %v504_v63  ;;  %v484_v3 = vld [vmem:[#allocation8] sm:$0xf]  ;;  %v579_v4 = vld [vmem:[#allocation8 + $0x8] sm:$0xf0]  ;;  %v578_v5 = vld [vmem:[#allocation8 + $0x4] sm:$0xf] }
  0x26   :  { %294 = vmatpush.bf16.msra.mxu1 %v537_v37  ;;  %307 = vmatpush.bf16.msra.mxu2 %v541_v38  ;;  %v485_v6 = vor.u32 %v579_v4, %v484_v3  ;;  %v486_v7 = vld [vmem:[#allocation8 + $0xc] sm:$0xf0]  ;;  %v492_v8 = vld [vmem:[#allocation8 + $0x8] sm:$0xf]  ;;  %v580_v9 = vld [vmem:[#allocation8 + $0x10] sm:$0xf0] }
  0x27   :  { %v489_v10 = vor.u32 %v578_v5, %v486_v7  ;;  %v493_v11 = vor.u32 %v580_v9, %v492_v8  ;;  %vm106_vm2 = vcmask 982528   ;;  %v757_v16 = vmov 8.0   ;;  %v142_v17 = vld [vmem:[#allocation10] ss:$8 sm:$0x7] }
  0x28   :  { %613 = vrcp.f32 %v757_v16  ;;  %v144_v19 = vperm.slane %v142_v17, 0  ;;  %v145_v20 = vperm.slane %v142_v17, 1  ;;  %v146_v29 = vperm.slane %v142_v17, 2 }
  0x29   :  { %282 = vmatpush.bf16.msra.mxu0 %v521_v43  ;;  %vm415_vm12 = vcmask 1040384   ;;  %vm417_vm14 = vcmask 1041408   ;;  %vm473_vm15 = vcmask 7168  }
  0x2a   :  { %295 = vmatpush.bf16.msra.mxu1 %v525_v47  ;;  %308 = vmatpush.bf16.msra.mxu2 %v529_v48 }
  0x2d   :  { %283 = vmatpush.bf16.msra.mxu0 %v509_v52 }
  0x2e   :  { %296 = vmatpush.bf16.msra.mxu1 %v513_v56  ;;  %309 = vmatpush.bf16.msra.mxu2 %v517_v57  ;;  %v614_v18 = vpop.eup %613 }
  0x2f   :  { %v339_v21 = vmul.f32 8.0, %v614_v18  ;;  %vm343_vm3 = vweird.f32 %v614_v18 }
  0x31   :  { %284 = vmatpush.bf16.msra.mxu0 %v497_v61  ;;  %v340_v26 = vsub.f32 1.0, %v339_v21 }
  0x32   :  { %297 = vmatpush.bf16.msra.mxu1 %v501_v1  ;;  %310 = vmatpush.bf16.msra.mxu2 %v505_v2 }
  0x33   :  { %v341_v32 = vmul.f32 %v614_v18, %v340_v26 }
  0x35   :  { %285 = vmatpush.bf16.msra.mxu0 %v485_v6  ;;  %v342_v41 = vadd.f32 %v614_v18, %v341_v32 }
  0x36   :  { %298 = vmatpush.bf16.msra.mxu1 %v489_v10  ;;  %311 = vmatpush.bf16.msra.mxu2 %v493_v11 }
  0x37   :  { %v344_v48 = vsel %vm343_vm3, %v614_v18, %v342_v41 }
  0x89   :  { %v97_v12 = vpop.permute.xlu0 %96 }
  0x8a   :  { %100 = vst.msk [vmem:[#allocation2] sm:$0xff] %vm99_vm1, %v97_v12 }
  0x91   :  { %v104_v13 = vpop.permute.xlu0 %103 }
  0x92   :  { %107 = vst.msk [vmem:[#allocation2] sm:$0xff] %vm106_vm2, %v104_v13 }
  0x99   :  { %v108_v14 = vld [vmem:[#allocation2] sm:$0xff] }
  0x9a   :  { %v109_v15 = vpack.c.bf16 %v108_v14, %v108_v14 }
  0x9c   :  { %286 = vmatmul.bf16.vlgmr.msra.gmra.mxu0 %v109_v15  ;;  %299 = vmatmul.bf16.vlgmr.msra.gmra.mxu1 %v109_v15 }
  0x9d   :  { %312 = vmatmul.bf16.vlgmr.msra.gmra.mxu2 %v109_v15 }
 0x119   :  { %v287_v22 = vpop.f32.mrf.mxu0  ;;  %v300_v23 = vpop.f32.mrf.mxu1 }
 0x11a   :  { %v288_v24 = vadd.f32 %v287_v22, %v144_v19  ;;  %v301_v25 = vadd.f32 %v300_v23, %v145_v20 }
 0x11c   :  { %v803_v27 = vmax.f32 %v288_v24, 0.0  ;;  %v805_v28 = vmax.f32 %v301_v25, 0.0 }
 0x11e   :  { %v320_v30 = vrot.slane %v803_v27, 4  ;;  %v326_v31 = vrot.slane %v805_v28, 4 }
 0x120   :  { %v321_v33 = vadd.f32 %v320_v30, %v803_v27  ;;  %v327_v34 = vadd.f32 %v326_v31, %v805_v28  ;;  %v313_v35 = vpop.f32.mrf.mxu2 }
 0x121   :  { %v314_v36 = vadd.f32 %v313_v35, %v146_v29  ;;  %v289_v37 = vpop.f32.mrf.mxu0  ;;  %v302_v38 = vpop.f32.mrf.mxu1 }
 0x122   :  { %v322_v39 = vrot.slane %v321_v33, 2  ;;  %v328_v40 = vrot.slane %v327_v34, 2 }
 0x123   :  { %v811_v42 = vmax.f32 %v314_v36, 0.0 }
 0x124   :  { %v323_v43 = vadd.f32 %v322_v39, %v321_v33  ;;  %v329_v44 = vadd.f32 %v328_v40, %v327_v34 }
 0x125   :  { %v332_v45 = vrot.slane %v811_v42, 4 }
 0x126   :  { %v324_v46 = vrot.slane %v323_v43, 1  ;;  %v330_v47 = vrot.slane %v329_v44, 1 }
 0x127   :  { %v333_v49 = vadd.f32 %v332_v45, %v811_v42 }
 0x128   :  { %v325_v50 = vadd.f32 %v324_v46, %v323_v43  ;;  %v331_v51 = vadd.f32 %v330_v47, %v329_v44  ;;  %v315_v52 = vpop.f32.mrf.mxu2 }
 0x129   :  { %v334_v53 = vrot.slane %v333_v49, 2 }
 0x12a   :  { %v815_v54 = vmul.f32 %v344_v48, %v325_v50  ;;  %v817_v55 = vmul.f32 %v344_v48, %v331_v51  ;;  %v376_v50 = vld [vmem:[#allocation10 + $0x1] ss:$8 sm:$0x7] }
 0x12b   :  { %v335_v56 = vadd.f32 %v334_v53, %v333_v49 }
 0x12c   :  { %v348_v57 = vsub.f32 %v803_v27, %v815_v54  ;;  %v349_v58 = vsub.f32 %v805_v28, %v817_v55 }
 0x12d   :  { %v336_v59 = vrot.slane %v335_v56, 1 }
 0x12e   :  { %v351_v60 = vmul.f32 %v348_v57, %v348_v57  ;;  %v352_v61 = vmul.f32 %v349_v58, %v349_v58 }
 0x12f   :  { %v337_v62 = vadd.f32 %v336_v59, %v335_v56 }
 0x130   :  { %v354_v63 = vrot.slane %v351_v60, 4  ;;  %v360_v0 = vrot.slane %v352_v61, 4 }
 0x131   :  { %v823_v1 = vmul.f32 %v344_v48, %v337_v62 }
 0x132   :  { %v355_v2 = vadd.f32 %v354_v63, %v351_v60  ;;  %v361_v3 = vadd.f32 %v360_v0, %v352_v61 }
 0x133   :  { %v350_v4 = vsub.f32 %v811_v42, %v823_v1 }
 0x134   :  { %v356_v5 = vrot.slane %v355_v2, 2  ;;  %v362_v6 = vrot.slane %v361_v3, 2 }
 0x135   :  { %v353_v7 = vmul.f32 %v350_v4, %v350_v4 }
 0x136   :  { %v357_v8 = vadd.f32 %v356_v5, %v355_v2  ;;  %v363_v9 = vadd.f32 %v362_v6, %v361_v3  ;;  %v422_v3 = vld [vmem:[#allocation10 + $0x2] ss:$8 sm:$0x7]  ;;  %v456_v5 = vld [vmem:[#allocation10 + $0x3] ss:$8 sm:$0x7] }
 0x137   :  { %v366_v10 = vrot.slane %v353_v7, 4 }
 0x138   :  { %v358_v11 = vrot.slane %v357_v8, 1  ;;  %v364_v12 = vrot.slane %v363_v9, 1 }
 0x139   :  { %v367_v13 = vadd.f32 %v366_v10, %v353_v7  ;;  %v458_v10 = vperm.slane %v456_v5, 0 }
 0x13a   :  { %v359_v14 = vadd.f32 %v358_v11, %v357_v8  ;;  %v365_v15 = vadd.f32 %v364_v12, %v363_v9  ;;  %v459_v11 = vperm.slane %v456_v5, 1 }
 0x13b   :  { %v368_v16 = vrot.slane %v367_v13, 2 }
 0x13c   :  { %v372_v17 = vmul.f32 %v359_v14, %v344_v48  ;;  %v373_v18 = vmul.f32 %v365_v15, %v344_v48 }
 0x13d   :  { %v369_v19 = vadd.f32 %v368_v16, %v367_v13  ;;  %v460_v16 = vperm.slane %v456_v5, 2 }
 0x13e   :  { %v377_v20 = vadd.f32 1e-05, %v372_v17  ;;  %v378_v21 = vadd.f32 1e-05, %v373_v18 }
 0x13f   :  { %v370_v22 = vrot.slane %v369_v19, 1 }
 0x140   :  { %615 = vrsqrt.f32 %v377_v20  ;;  %vm396_vm5 = vweird.f32 %v378_v21  ;;  %vm386_vm10 = vweird.f32 %v377_v20 }
 0x141   :  { %617 = vrsqrt.f32 %v378_v21  ;;  %v371_v23 = vadd.f32 %v370_v22, %v369_v19 }
 0x143   :  { %v374_v24 = vmul.f32 %v371_v23, %v344_v48 }
 0x145   :  { %v379_v25 = vadd.f32 1e-05, %v374_v24 }
 0x146   :  { %v616_v26 = vpop.eup %615 }
 0x147   :  { %v618_v29 = vpop.eup %617  ;;  %v381_v30 = vmul.f32 %v616_v26, %v377_v20  ;;  %619 = vrsqrt.f32 %v379_v25  ;;  %vm387_vm8 = vweird.f32 %v616_v26  ;;  %vm406_vm9 = vweird.f32 %v379_v25 }
 0x148   :  { %v391_v31 = vmul.f32 %v618_v29, %v378_v21  ;;  %vm397_vm4 = vweird.f32 %v618_v29  ;;  %vm388_vm13 = vmor %vm386_vm10, %vm387_vm8 }
 0x149   :  { %v382_v32 = vmul.f32 %v616_v26, %v381_v30  ;;  %vm398_vm6 = vmor %vm396_vm5, %vm397_vm4 }
 0x14a   :  { %v392_v33 = vmul.f32 %v618_v29, %v391_v31 }
 0x14b   :  { %v383_v36 = vmul.f32 0.5, %v382_v32 }
 0x14c   :  { %v393_v34 = vmul.f32 0.5, %v392_v33 }
 0x14d   :  { %v620_v35 = vpop.eup %619  ;;  %v384_v41 = vsub.f32 1.5, %v383_v36 }
 0x14e   :  { %v394_v37 = vsub.f32 1.5, %v393_v34  ;;  %v401_v38 = vmul.f32 %v620_v35, %v379_v25  ;;  %vm407_vm7 = vweird.f32 %v620_v35 }
 0x14f   :  { %v385_v46 = vmul.f32 %v616_v26, %v384_v41  ;;  %vm408_vm11 = vmor %vm406_vm9, %vm407_vm7 }
 0x150   :  { %v402_v39 = vmul.f32 %v620_v35, %v401_v38  ;;  %v395_v40 = vmul.f32 %v618_v29, %v394_v37 }
 0x151   :  { %v389_v51 = vsel %vm388_vm13, %v616_v26, %v385_v46 }
 0x152   :  { %v403_v43 = vmul.f32 0.5, %v402_v39  ;;  %v399_v44 = vsel %vm398_vm6, %v618_v29, %v395_v40 }
 0x153   :  { %v413_v48 = vrot.slane %v399_v44, 7 }
 0x154   :  { %v404_v45 = vsub.f32 1.5, %v403_v43 }
 0x155   :  { %v416_v53 = vsel %vm415_vm12, %v389_v51, %v413_v48 }
 0x156   :  { %v405_v47 = vmul.f32 %v620_v35, %v404_v45 }
 0x158   :  { %v409_v49 = vsel %vm408_vm11, %v620_v35, %v405_v47 }
 0x159   :  { %v414_v52 = vrot.slane %v409_v49, 6 }
 0x15b   :  { %v418_v56 = vsel %vm417_vm14, %v416_v53, %v414_v52 }
 0x15c   :  { %v420_v57 = vmul.f32 %v418_v56, %v376_v50 }
 0x15e   :  { %v424_v58 = vperm.slane %v420_v57, 0  ;;  %v425_v59 = vperm.slane %v420_v57, 1  ;;  %v426_v60 = vperm.slane %v420_v57, 2 }
 0x160   :  { %v431_v61 = vmul.f32 %v425_v59, %v817_v55  ;;  %v432_v62 = vmul.f32 %v426_v60, %v823_v1  ;;  %v430_v63 = vmul.f32 %v424_v58, %v815_v54  ;;  %v442_v8 = vmul.f32 %v424_v58, %v803_v27  ;;  %v471_v27 = vld [vmem:[#allocation10 + $0x4] ss:$0 sm:$0xff] }
 0x161   :  { %v443_v9 = vmul.f32 %v425_v59, %v805_v28  ;;  %v444_v55 = vmul.f32 %v426_v60, %v811_v42 }
 0x162   :  { %v436_v0 = vrot.slane %v431_v61, 7  ;;  %v437_v2 = vrot.slane %v432_v62, 6 }
 0x164   :  { %v438_v4 = vsel %vm415_vm12, %v430_v63, %v436_v0 }
 0x165   :  { %v439_v6 = vsel %vm417_vm14, %v438_v4, %v437_v2 }
 0x166   :  { %v441_v7 = vsub.f32 %v422_v3, %v439_v6 }
 0x168   :  { %v446_v1 = vperm.slane %v441_v7, 0  ;;  %v447_v12 = vperm.slane %v441_v7, 1  ;;  %v448_v54 = vperm.slane %v441_v7, 2 }
 0x16a   :  { %v452_v13 = vadd.f32 %v446_v1, %v442_v8  ;;  %v453_v14 = vadd.f32 %v447_v12, %v443_v9  ;;  %v454_v15 = vadd.f32 %v448_v54, %v444_v55 }
 0x16c   :  { %v464_v17 = vmul.f32 %v458_v10, %v452_v13  ;;  %v465_v18 = vmul.f32 %v459_v11, %v453_v14  ;;  %v466_v19 = vmul.f32 %v460_v16, %v454_v15 }
 0x16e   :  { %v467_v20 = vadd.f32 %v465_v18, %v464_v17 }
 0x170   :  { %v468_v21 = vadd.f32 %v467_v20, %v466_v19 }
 0x172   :  { %469 = vadd.xlane.f32.xlu1 %v468_v21 }
 0x1e5   :  { %v470_v28 = vpop.xlane.xlu1 %469 }
 0x1e6   :  { %v472_v22 = vadd.f32 %v471_v27, %v470_v28 }
 0x1e8   :  { %474 = vst.msk [vmem:[%s845_s5] sm:$0xff] %vm473_vm15, %v472_v22 }
 0x1e9   :  { %479 = vsyncpa [#allocation4], 1 }
 0x1ea   :  { %480 = vsyncpa [#allocation6], 1 }
 0x1eb   :  { %481 = vsyncpa [#allocation9], 1 }

</bundles_post_ra>
